<compile_context>
chip_gen: v7x
topology: tpu7x:2x2x1
jax: 0.10.0
libtpu: 0.0.40
codegen_flags: <defaults>
</compile_context>

<pallas_src>
import functools

import jax
import jax.numpy as jnp
from jax import lax
from jax.experimental import pallas as pl
from jax.experimental.pallas import tpu as pltpu


def _round_up(x: int, m: int) -> int:
    return (x + m - 1) // m * m


def _supports_bf16_epilogue() -> bool:
    """bf16 VPU/EUP exists on v6e/v7x; keep f32 on v5e/older/unknown."""
    try:
        kind = jax.devices()[0].device_kind.lower()
    except Exception:
        return False
    return ("v6" in kind) or ("v7" in kind) or ("7x" in kind)


# ----------------------------- Pallas kernel -------------------------------

def _stem_pool_kernel(p_ref, w_ref, shift_ref, o_ref, pool_ref, *,
                      inv_spatial, valid_rows, tile_p, bf16_epilogue):
    """Fused stem conv (im2col matmul) + BN + SiLU + global-average-pool.

    Grid = (batch, spatial_tiles); the spatial axis is the reduction.

    p_ref:     (1, TILE_P, K)  bf16 im2col patches (K = C*9, unpadded in HBM)
    w_ref:     (K, OCPAD)      bf16 conv weight, BN scale pre-folded
    shift_ref: (1, OCPAD)      f32  BN shift (beta - mean*scale)
    o_ref:     (1, 1, OCPAD)   f32  pooled (mean) stem features for this image
    pool_ref:  (8, OCPAD)      f32  VMEM pooled-sum accumulator (one vreg)
    """
    s = pl.program_id(1)

    @pl.when(s == 0)
    def _init():
        pool_ref[...] = jnp.zeros_like(pool_ref)

    # Stem conv as an MXU matmul (bf16 operands, f32 accumulation).  K = C*9 is
    # left unpadded; Mosaic pads the contraction inside VMEM.
    y = jnp.dot(p_ref[0], w_ref[...], preferred_element_type=jnp.float32)

    if bf16_epilogue:
        yb = (y + shift_ref[...]).astype(jnp.bfloat16)
        y = (yb * jax.nn.sigmoid(yb)).astype(jnp.float32)   # SiLU, bf16 EUP/VPU
    else:
        y = y + shift_ref[...]
        y = y * jax.nn.sigmoid(y)                            # SiLU, f32 (v5e)

    if valid_rows is not None:
        # Tail tile of a padded spatial axis: zero out rows past the real
        # spatial extent so they do not pollute the pooled sum.
        row = s * tile_p + lax.broadcasted_iota(jnp.int32, (tile_p, 1), 0)
        y = jnp.where(row < valid_rows, y, 0.0)

    # Vreg-wise accumulate: (tile_p, OCPAD) -> (tile_p/8, 8, OCPAD) -> (8, OCPAD).
    pool_ref[...] += jnp.sum(y.reshape(tile_p // 8, 8, -1), axis=0)

    @pl.when(s == pl.num_programs(1) - 1)
    def _finalize():
        # One cross-sublane reduce + scale per image.
        o_ref[0] = jnp.sum(pool_ref[...], axis=0, keepdims=True) * inv_spatial


# ------------------------------- glue (JAX) --------------------------------

def _im2col(x, kh, kw, stride, pad):
    """x: (N, C, H, W) -> patches (N, OH*OW, C*kh*kw), plus (OH, OW)."""
    n, c, h, w = x.shape
    xp = jnp.pad(x, ((0, 0), (0, 0), (pad, pad), (pad, pad)))
    oh = (h + 2 * pad - kh) // stride + 1
    ow = (w + 2 * pad - kw) // stride + 1
    cols = []
    for i in range(kh):
        for j in range(kw):
            cols.append(xp[:, :, i:i + stride * oh:stride, j:j + stride * ow:stride])
    # (kh*kw, N, C, OH, OW) -> (N, OH, OW, C, kh, kw)
    patches = jnp.stack(cols, axis=0).reshape(kh, kw, n, c, oh, ow)
    patches = patches.transpose(2, 4, 5, 3, 0, 1)
    return patches.reshape(n, oh * ow, c * kh * kw), oh, ow


def torchvision_forward(x, params, *, tile_p=None, bf16_epilogue=None):
    """x: (N, C, H, W) float32 -> logits (N, out_channels) float32."""
    n, c, _, _ = x.shape
    conv_w = params["conv_w"]                         # (OC, C, 3, 3)
    oc = conv_w.shape[0]
    fc_w = params["fc_w"]                             # (OC, n_cls)

    if bf16_epilogue is None:
        bf16_epilogue = _supports_bf16_epilogue()

    # -- im2col patches (N, P, K) with K = C*9, kept UNPADDED in HBM --
    patches, oh, ow = _im2col(x, 3, 3, stride=2, pad=1)
    p_total = oh * ow
    k_raw = c * 9

    ocpad = _round_up(max(oc, 128), 128)              # lane-dense stem channels

    # -- fold BN scale into conv weights; cast matmul operands to bf16 --
    eps = 1e-5
    scale = params["bn_gamma"] * lax.rsqrt(params["bn_var"] + eps)     # (OC,)
    shift = params["bn_beta"] - params["bn_mean"] * scale              # (OC,)
    w2d = conv_w.reshape(oc, k_raw).T * scale[None, :]                 # (K, OC)
    w_pad = (jnp.zeros((k_raw, ocpad), jnp.float32)
             .at[:, :oc].set(w2d).astype(jnp.bfloat16))
    shift_pad = jnp.zeros((1, ocpad), jnp.float32).at[0, :oc].set(shift)

    # -- spatial tile: large default, multiple of 16 (bf16 sublane packing);
    #    pad P up to a multiple of the tile and mask the tail in-kernel --
    if tile_p is None:
        tile_p = min(_round_up(p_total, 16), 2048)
    tile_p = max(16, _round_up(tile_p, 16))
    p_pad = _round_up(p_total, tile_p)

    patches_b = patches.astype(jnp.bfloat16)
    if p_pad != p_total:
        patches_b = jnp.pad(patches_b, ((0, 0), (0, p_pad - p_total), (0, 0)))
        valid_rows = p_total
    else:
        valid_rows = None

    grid = (n, p_pad // tile_p)

    pooled = pl.pallas_call(
        functools.partial(_stem_pool_kernel,
                          inv_spatial=1.0 / p_total,
                          valid_rows=valid_rows,
                          tile_p=tile_p,
                          bf16_epilogue=bf16_epilogue),
        out_shape=jax.ShapeDtypeStruct((n, 1, ocpad), jnp.float32),
        grid_spec=pltpu.PrefetchScalarGridSpec(
            num_scalar_prefetch=0,
            grid=grid,
            in_specs=[
                # last block dim == full array dim (K unpadded) is allowed.
                pl.BlockSpec((1, tile_p, k_raw), lambda b, s: (b, s, 0)),
                pl.BlockSpec((k_raw, ocpad), lambda b, s: (0, 0)),
                pl.BlockSpec((1, ocpad), lambda b, s: (0, 0)),
            ],
            out_specs=pl.BlockSpec((1, 1, ocpad), lambda b, s: (b, 0, 0)),
            scratch_shapes=[pltpu.VMEM((8, ocpad), jnp.float32)],
        ),
        compiler_params=pltpu.CompilerParams(
            dimension_semantics=("parallel", "arbitrary")),
    )(patches_b, w_pad, shift_pad)

    pooled = pooled[:, 0, :oc]                        # (N, OC) f32
    # Tiny classifier FC in XLA (f32), per the review.
    return pooled @ fc_w + params["fc_b"]


# --------------------------- pure-JAX reference -----------------------------

def _reference_forward(x, params):
    y = lax.conv_general_dilated(
        x, params["conv_w"], window_strides=(2, 2), padding=((1, 1), (1, 1)),
        dimension_numbers=("NCHW", "OIHW", "NCHW"))
    eps = 1e-5
    scale = params["bn_gamma"] / jnp.sqrt(params["bn_var"] + eps)
    shift = params["bn_beta"] - params["bn_mean"] * scale
    y = y * scale[None, :, None, None] + shift[None, :, None, None]
    y = y * jax.nn.sigmoid(y)
    pooled = y.mean(axis=(2, 3))
    return pooled @ params["fc_w"] + params["fc_b"]


# ---------------------------------- main -----------------------------------

if __name__ == "__main__":
    in_channels = 4
    out_channels = 6
    stem_out = 32
    n, h, w = 2, 16, 16

    key = jax.random.PRNGKey(0)
    kx, kc, km, kv, kw_, kb = jax.random.split(key, 6)

    x = jax.random.normal(kx, (n, in_channels, h, w), dtype=jnp.float32)

    params = {
        # stem conv (bias=False, matching the replaced first layer)
        "conv_w": 0.1 * jax.random.normal(kc, (stem_out, in_channels, 3, 3), jnp.float32),
        # BatchNorm2d running stats / affine params
        "bn_gamma": jnp.ones((stem_out,), jnp.float32),
        "bn_beta": jnp.zeros((stem_out,), jnp.float32),
        "bn_mean": 0.05 * jax.random.normal(km, (stem_out,), jnp.float32),
        "bn_var": 1.0 + 0.1 * jax.nn.softplus(jax.random.normal(kv, (stem_out,), jnp.float32)),
        # final classifier Linear (replaced last layer -> out_channels)
        "fc_w": 0.1 * jax.random.normal(kw_, (stem_out, out_channels), jnp.float32),
        "fc_b": 0.01 * jax.random.normal(kb, (out_channels,), jnp.float32),
    }

    ref = _reference_forward(x, params)

    # tile_p=16: 4-step spatial accumulation per image (even division).
    # tile_p=48: padded spatial axis (64 -> 96) exercising the masked tail tile.
    # tile_p=None: default large tile, single-step init+finalize path.
    for tp in (16, 48, None):
        fwd = jax.jit(functools.partial(torchvision_forward, tile_p=tp))
        logits = fwd(x, params)
        jax.block_until_ready(logits)

        assert logits.shape == (n, out_channels), (tp, logits.shape)
        assert logits.dtype == jnp.float32
        max_err = float(jnp.max(jnp.abs(logits - ref)))
        assert max_err < 3e-2, f"tile_p={tp}: max abs err vs reference: {max_err}"

    print("KERNEL_OK")
</pallas_src>

<mosaic_0001>
module attributes {stable_mosaic.version = 11 : i64} {
  func.func @_stem_pool_kernel(%arg0: i32, %arg1: i32, %arg2: memref<1x16x36xbf16, #tpu.memory_space<vmem>>, %arg3: memref<36x128xbf16, #tpu.memory_space<vmem>>, %arg4: memref<1x128xf32, #tpu.memory_space<vmem>>, %arg5: memref<1x1x128xf32, #tpu.memory_space<vmem>>, %arg6: memref<8x128xf32, #tpu.memory_space<vmem>>) attributes {dimension_semantics = [#tpu.dimension_semantics<parallel>, #tpu.dimension_semantics<arbitrary>], iteration_bounds = array<i64: 2, 4>, scalar_prefetch = 0 : i64, scratch_operands = 1 : i64, tpu.core_type = #tpu.core_type<tc>, window_params = [{transform_indices = @transform_0, window_bounds = array<i64: 1, 16, 36>}, {pipeline_mode = #tpu.pipeline_mode<synchronous>, transform_indices = @transform_1, window_bounds = array<i64: 36, 128>}, {pipeline_mode = #tpu.pipeline_mode<synchronous>, transform_indices = @transform_2, window_bounds = array<i64: 1, 128>}, {transform_indices = @transform_3, window_bounds = array<i64: 1, 1, 128>}]} {
    %c0_i32 = arith.constant 0 : i32
    %0 = arith.cmpi eq, %arg1, %c0_i32 : i32
    %1 = arith.extui %0 : i1 to i32
    %c0_i32_0 = arith.constant 0 : i32
    %2 = arith.cmpi ne, %1, %c0_i32_0 : i32
    scf.if %2 {
      %cst_14 = arith.constant 0.000000e+00 : f32
      %24 = vector.broadcast %cst_14 : f32 to vector<8x128xf32>
      %c0_15 = arith.constant 0 : index
      %c0_16 = arith.constant 0 : index
      %25 = vector.load %arg6[%c0_15, %c0_16] : memref<8x128xf32, #tpu.memory_space<vmem>>, vector<8x128xf32>
      tpu.vector_store %arg6[%c0_15, %c0_16], %24 {strides = array<i32>} : memref<8x128xf32, #tpu.memory_space<vmem>>, vector<8x128xf32>,
    } else {
    }
    %c0 = arith.constant 0 : index
    %c0_1 = arith.constant 0 : index
    %c0_2 = arith.constant 0 : index
    %3 = vector.load %arg2[%c0, %c0_1, %c0_2] : memref<1x16x36xbf16, #tpu.memory_space<vmem>>, vector<1x16x36xbf16>
    %4 = vector.shape_cast %3 : vector<1x16x36xbf16> to vector<16x36xbf16>
    %c0_3 = arith.constant 0 : index
    %c0_4 = arith.constant 0 : index
    %5 = vector.load %arg3[%c0_3, %c0_4] : memref<36x128xbf16, #tpu.memory_space<vmem>>, vector<36x128xbf16>
    %cst = arith.constant dense<0.000000e+00> : vector<16x128xf32>
    %6 = tpu.matmul %4, %5, %cst {dimension_numbers = #tpu.dot_dimension_numbers<[1], [0], [0], [1], [0, 0, 1, 1], [], []>} : vector<16x36xbf16>, vector<36x128xbf16>, vector<16x128xf32> -> vector<16x128xf32>
    %c0_5 = arith.constant 0 : index
    %c0_6 = arith.constant 0 : index
    %7 = vector.load %arg4[%c0_5, %c0_6] : memref<1x128xf32, #tpu.memory_space<vmem>>, vector<1x128xf32>
    %8 = vector.broadcast %7 : vector<1x128xf32> to vector<16x128xf32>
    %9 = arith.addf %6, %8 : vector<16x128xf32>
    %10 = arith.negf %9 : vector<16x128xf32>
    %11 = math.exp %10 : vector<16x128xf32>
    %cst_7 = arith.constant 1.000000e+00 : f32
    %12 = vector.broadcast %cst_7 : f32 to vector<16x128xf32>
    %13 = arith.addf %12, %11 : vector<16x128xf32>
    %14 = arith.divf %12, %13 : vector<16x128xf32>
    %15 = arith.mulf %9, %14 : vector<16x128xf32>
    %c0_8 = arith.constant 0 : index
    %c0_9 = arith.constant 0 : index
    %16 = vector.load %arg6[%c0_8, %c0_9] : memref<8x128xf32, #tpu.memory_space<vmem>>, vector<8x128xf32>
    %17 = vector.shape_cast %15 : vector<16x128xf32> to vector<2x8x128xf32>
    %cst_10 = arith.constant dense<0.000000e+00> : vector<8x128xf32>
    %18 = vector.multi_reduction <add>, %17, %cst_10 [0] : vector<2x8x128xf32> to vector<8x128xf32>
    %19 = arith.addf %16, %18 : vector<8x128xf32>
    %c0_11 = arith.constant 0 : index
    %c0_12 = arith.constant 0 : index
    %20 = vector.load %arg6[%c0_11, %c0_12] : memref<8x128xf32, #tpu.memory_space<vmem>>, vector<8x128xf32>
    tpu.vector_store %arg6[%c0_11, %c0_12], %19 {strides = array<i32>} : memref<8x128xf32, #tpu.memory_space<vmem>>, vector<8x128xf32>,
    %c3_i32 = arith.constant 3 : i32
    %21 = arith.cmpi eq, %arg1, %c3_i32 : i32
    %22 = arith.extui %21 : i1 to i32
    %c0_i32_13 = arith.constant 0 : i32
    %23 = arith.cmpi ne, %22, %c0_i32_13 : i32
    scf.if %23 {
      %c0_14 = arith.constant 0 : index
      %c0_15 = arith.constant 0 : index
      %24 = vector.load %arg6[%c0_14, %c0_15] : memref<8x128xf32, #tpu.memory_space<vmem>>, vector<8x128xf32>
      %cst_16 = arith.constant dense<0.000000e+00> : vector<128xf32>
      %25 = vector.multi_reduction <add>, %24, %cst_16 [0] : vector<8x128xf32> to vector<128xf32>
      %26 = vector.shape_cast %25 : vector<128xf32> to vector<1x128xf32>
      %cst_17 = arith.constant 1.562500e-02 : f32
      %27 = vector.broadcast %cst_17 : f32 to vector<1x128xf32>
      %28 = arith.mulf %26, %27 : vector<1x128xf32>
      %c0_18 = arith.constant 0 : index
      %c0_19 = arith.constant 0 : index
      %c0_20 = arith.constant 0 : index
      %29 = vector.load %arg5[%c0_18, %c0_19, %c0_20] : memref<1x1x128xf32, #tpu.memory_space<vmem>>, vector<1x1x128xf32>
      %30 = vector.shape_cast %29 : vector<1x1x128xf32> to vector<1x128xf32>
      %31 = vector.shape_cast %28 : vector<1x128xf32> to vector<1x1x128xf32>
      tpu.vector_store %arg5[%c0_18, %c0_19, %c0_20], %31 {strides = array<i32>} : memref<1x1x128xf32, #tpu.memory_space<vmem>>, vector<1x1x128xf32>,
    } else {
    }
    return
  }
  func.func @transform_0(%arg0: i32, %arg1: i32) -> (i32, i32, i32) {
    %c0_i32 = arith.constant 0 : i32
    %c0_i32_0 = arith.constant 0 : i32
    return %arg0, %arg1, %c0_i32 : i32, i32, i32
  }
  func.func @transform_1(%arg0: i32, %arg1: i32) -> (i32, i32) {
    %c0_i32 = arith.constant 0 : i32
    %c0_i32_0 = arith.constant 0 : i32
    %c0_i32_1 = arith.constant 0 : i32
    return %c0_i32, %c0_i32_0 : i32, i32
  }
  func.func @transform_2(%arg0: i32, %arg1: i32) -> (i32, i32) {
    %c0_i32 = arith.constant 0 : i32
    %c0_i32_0 = arith.constant 0 : i32
    %c0_i32_1 = arith.constant 0 : i32
    return %c0_i32, %c0_i32_0 : i32, i32
  }
  func.func @transform_3(%arg0: i32, %arg1: i32) -> (i32, i32, i32) {
    %c0_i32 = arith.constant 0 : i32
    %c0_i32_0 = arith.constant 0 : i32
    %c0_i32_1 = arith.constant 0 : i32
    return %arg0, %c0_i32, %c0_i32_0 : i32, i32, i32
  }
}

</mosaic_0001>

<bundles_post_ra>
// kernel: torchvision_forward.1
= control target key start
LH: loop header
LB: loop body
LE: loop exit
PB: predicated region body
PF: predicated region fallthrough
CT: control target
= control target key end

     0   :  { %s531_s12 = smov 0   ;;  %s533_s13 = smov 0   ;;  %s608_s0 = inlined_call_operand.vmem [shape: bf16[2,64,36], index: 0, kind: input, shape index: {}]   ;;  %s609_s1 = inlined_call_operand.vmem [shape: bf16[36,128], index: 1, kind: input, shape index: {}]   ;;  %s610_s2 = inlined_call_operand.vmem [shape: f32[1,128], index: 2, kind: input, shape index: {}]   ;;  %s611_s3 = inlined_call_operand.vmem [shape: f32[2,1,128], index: 3, kind: output, shape index: {}]  }
   0x1   :  { %s535_s14 = smov 0   ;;  %s537_s15 = smov 0  }
   0x2   :  { %s539_s16 = smov 0  }
   0x3 LB: > { %s22_s17 = sadd.s32 1, %s498_s14  ;;  %s25_s18 = sadd.s32 1, %s502_s15  ;;  %s506_s16 = sphi %s539_s16, %s13_s16   ;;  %s502_s15 = sphi %s537_s15, %s615_s15   ;;  %s498_s14 = sphi %s535_s14, %s614_s14   ;;  %s494_s13 = sphi %s533_s13, %s613_s13   ;;  %s490_s12 = sphi %s531_s12, %s612_s12  }
   0x4   : > { %p23_p0 = scmp.ge.s32.totalorder %s22_s17, 4  ;;  %p383_p1 = scmp.ge.s32.totalorder %s506_s16, 1 }
   0x5   : > { %p156_p2 = scmp.lt.s32.totalorder %s506_s16, 9 }
   0x6   : > { %s617_s17 = smov (%p23_p0, %s22_s17), 0  ;;  %s619_s18 = smov (!%p23_p0, %s25_s18), %s502_s15 }
   0x7   : > { %p157_p3 = pnand %p383_p1, %p156_p2  ;;  %p27_p4 = scmp.ge.s32.totalorder %s619_s18, 2 }
   0x8   : > { %s384_s19 = sshll.u32 (!%p157_p3), %s490_s12, 1  ;;  %p183_p5 = scmp.lt.s32.totalorder (!%p157_p3), %s494_s13, 1 }
   0x9   : > { %s621_s18 = smov (%p27_p4, %s619_s18), 0  ;;  %160 = sbr.rel (%p157_p3) target bundleno = 309 (0x135), region = 32 }
   0xa   : > { %p185_p6 = scmp.lt.s32.totalorder (!%p157_p3), %s384_s19, 7  ;;  %p387_p7 = scmp.ne.s32.totalorder (!%p157_p3), %s490_s12, 0 }
  0x10   : > { %s623_s13 = smov (!%p183_p5, %s494_s13), 1  ;;  %s625_s19 = smov (!%p185_p6, %s384_s19), 7 }
  0x11   : > { %s385_s20 = sshll.u32 %s623_s13, 3  ;;  %s194_s23 = scalar_lea.vmem %s611_s3, %s623_s13  ;;  %v508_v0 = vmov (!%p387_p7), 0.0  }
  0x12   : > { %s188_s24 = sadd.s32 %s385_s20, %s625_s19  ;;  %199 = sbr.rel (%p387_p7) target bundleno = 25 (0x19), region = 36  ;;  %200 = vst [vmem:[#allocation2] sm:$0xff] (!%p387_p7), %v508_v0 }
  0x13   : > { %s386_s25 = sshll.u32 %s188_s24, 2 }
  0x14   : > { %s190_s28 = scalar_lea.vmem %s608_s0, %s386_s25 }
  0x19 PF: > { %v456_v1 = vld [vmem:[%s609_s1] sm:$0xff]   ;;  %v509_v2 = vmov 0.0   ;;  %v457_v3 = vld [vmem:[%s609_s1 + $0x8] sm:$0xff]   ;;  %v458_v4 = vld [vmem:[%s609_s1 + $0x10] ss:$0 sps:$4 sm:$0x33]  }
  0x1a   : > { %403 = vmatprep.subr.bf16.mxu0 %v509_v2  ;;  %vm510_vm0 = vmmov 0   ;;  %vm239_vm1 = vcmask 1041408   ;;  %v459_v6 = vld [vmem:[%s190_s28] sm:$0xff]   ;;  %vm235_vm2 = vcmask 293888   ;;  %p396_p8 = scmp.ne.s32.totalorder %s490_s12, 3 }
  0x1b   : > { %404 = vmatpush3.bf16.msra.mxu0 %v456_v1  ;;  %409 = vmatprep.mubr.msk.bf16.mxu0 %vm510_vm0, %v509_v2  ;;  %v241_v5 = vsel %vm239_vm1, %v458_v4, 0  ;;  %v388_v7 = vld [vmem:[%s610_s2] ss:$0 sm:$0xff] }
  0x1c   : > { %405 = vmatprep.subr.bf16.mxu0 %v509_v2  ;;  %v298_v24 = vld [vmem:[#allocation2] sm:$0xff] }
  0x1f   : > { %406 = vmatpush3.bf16.msra.mxu0 %v457_v3 }
  0x20   : > { %407 = vmatprep.subr.bf16.mxu0 %v509_v2 }
  0x23   : > { %408 = vmatpush3.bf16.msra.mxu0 %v241_v5 }
  0x26   : > { %410 = vmatmul.mubr.msk.bf16.vlgmr.msra.gmra.mrb[0].mxu0 %vm235_vm2, %v459_v6 }
  0xf9   : > { %v277_v8 = vpop.f32.mrb[0].mxu0 }
  0xfa   : > { %v278_v9 = vadd.f32 %v388_v7, %v277_v8  ;;  %v411_v10 = vpop.f32.mrb[1].mxu0 }
  0xfb   : > { %v280_v11 = vpop.f32.mrb[2].mxu0 }
  0xfc   : > { %v394_v12 = vmul.f32 -1.442695, %v278_v9  ;;  %v281_v13 = vadd.f32 %v388_v7, %v280_v11  ;;  %v412_v14 = vpop.f32.mrb[3].mxu0 }
  0xfe   : > { %460 = vpow2.f32 %v394_v12  ;;  %v395_v15 = vmul.f32 -1.442695, %v281_v13 }
 0x100   : > { %462 = vpow2.f32 %v395_v15 }
 0x108   : > { %v461_v16 = vpop.eup %460 }
 0x109   : > { %v290_v17 = vadd.f32 1.0, %v461_v16 }
 0x10a   : > { %v463_v18 = vpop.eup %462 }
 0x10b   : > { %464 = vrcp.f32 %v290_v17  ;;  %v291_v19 = vadd.f32 1.0, %v463_v18 }
 0x10d   : > { %466 = vrcp.f32 %v291_v19 }
 0x115   : > { %v465_v20 = vpop.eup %464 }
 0x116   : > { %v296_v22 = vmul.f32 %v465_v20, %v278_v9 }
 0x117   : > { %v467_v21 = vpop.eup %466 }
 0x118   : > { %v297_v23 = vmul.f32 %v467_v21, %v281_v13  ;;  %305 = sbr.rel (%p396_p8) target bundleno = 309 (0x135), region = 40 }
 0x11a   : > { %v299_v25 = vadd.f32 %v297_v23, %v296_v22 }
 0x11c   : > { %v300_v26 = vadd.f32 %v299_v25, %v298_v24 }
 0x11e   : > { %301 = vst [vmem:[#allocation2] sm:$0xff] %v300_v26 }
 0x125   : > { %v306_v27 = vld [vmem:[#allocation2] sm:$0xff] }
 0x126   : > { %v307_v28 = vrot.slane %v306_v27, 4 }
 0x128   : > { %v308_v29 = vadd.f32 %v307_v28, %v306_v27 }
 0x12a   : > { %v309_v30 = vrot.slane %v308_v29, 2 }
 0x12c   : > { %v310_v31 = vadd.f32 %v309_v30, %v308_v29 }
 0x12e   : > { %v311_v32 = vrot.slane %v310_v31, 1 }
 0x130   : > { %v312_v33 = vadd.f32 %v311_v32, %v310_v31 }
 0x132   : > { %v313_v34 = vmul.f32 0.015625, %v312_v33 }
 0x134   : > { %314 = vst [vmem:[%s194_s23] sm:$0x1] %v313_v34 }
 0x135 PF: > { %s13_s16 = sadd.s32 1, %s506_s16   ;;  %s612_s12 = smov %s498_s14 }
 0x136   : > { %p10_p9 = scmp.ge.s32.totalorder %s13_s16, 10   ;;  %s613_s13 = smov %s502_s15 }
 0x137   : > { %s614_s14 = smov %s617_s17  ;;  %s615_s15 = smov %s621_s18 }
 0x138   :  { %12 = sbr.rel (!%p10_p9) target bundleno = 3 (0x3), region = 70 }

</bundles_post_ra>
